<compile_context>
chip_gen: v7x
topology: tpu7x:2x2x1
jax: 0.10.0
libtpu: 0.0.40
codegen_flags: <defaults>
</compile_context>

<pallas_src>
import jax
import jax.numpy as jnp
from jax.experimental import pallas as pl
from jax.experimental.pallas import tpu as pltpu


LANE = 128          # lane width: hidden feature dims padded to multiples of this
SUBLANE = 8         # f32 sublane: batch tiles are multiples of this
MAX_B_TILE = 1024   # batch rows per grid step (footprint ~5 MB, well under VMEM)


def _round_up(x, m):
    return ((x + m - 1) // m) * m


def _cdiv(a, b):
    return -(-a // b)


def fcnn_kernel(maps_ref, act_ref, w1m_ref, w1a_ref, b1_ref,
                w2_ref, b2_ref, w4_ref, b4_ref, out_ref):
    # h1 = ReLU(maps @ W1m + action @ W1a + b1)  -- split-W1 == concat'd input.
    h1 = jnp.dot(maps_ref[...], w1m_ref[...], preferred_element_type=jnp.float32)
    h1 = h1 + jnp.dot(act_ref[...], w1a_ref[...], preferred_element_type=jnp.float32)
    h1 = jnp.maximum(h1 + b1_ref[...], 0.0)

    # h2 = ReLU(h1 @ W2 + b2)
    h2 = jnp.maximum(
        jnp.dot(h1, w2_ref[...], preferred_element_type=jnp.float32) + b2_ref[...],
        0.0)

    # NOTE: the PyTorch module computes h3 = ReLU(layer3(h2)) but never uses it;
    # it is intentionally omitted (the output depends only on h2).
    out_ref[...] = (
        jnp.dot(h2, w4_ref[...], preferred_element_type=jnp.float32) + b4_ref[...])


def prepare_params(params, maps_features):
    """Split W1 into maps/action parts and pad hidden dims to LANE multiples.

    `params` is ((w1,b1),(w2,b2),(w3,b3),(w4,b4)), weights (in, out), biases
    (1, out).  Layer 3 is dead in the forward pass and is dropped here.  The
    output dim is NOT padded (lane-sparse final store, lane-dense HBM write).
    """
    (w1, b1), (w2, b2), (_w3, _b3), (w4, b4) = params   # layer3 unused
    h1 = w1.shape[1]
    h2 = w2.shape[1]
    out_dim = w4.shape[1]

    h1p = _round_up(h1, LANE)
    h2p = _round_up(h2, LANE)

    w1m = jnp.pad(w1[:maps_features], ((0, 0), (0, h1p - h1)))
    w1a = jnp.pad(w1[maps_features:], ((0, 0), (0, h1p - h1)))
    b1p = jnp.pad(b1, ((0, 0), (0, h1p - h1)))
    w2p = jnp.pad(w2, ((0, h1p - w2.shape[0]), (0, h2p - h2)))
    b2p = jnp.pad(b2, ((0, 0), (0, h2p - h2)))
    w4p = jnp.pad(w4, ((0, h2p - w4.shape[0]), (0, 0)))   # no output-lane padding
    return (w1m, w1a, b1p, w2p, b2p, w4p, b4), out_dim


def _choose_b_tile(B, b_tile_req):
    """Pick a legal batch tile: multiple of 8, capped, >=2 grid steps when big."""
    bt = _round_up(max(1, min(int(b_tile_req), MAX_B_TILE)), SUBLANE)
    # Tiny batches collapse to a single (possibly partial) tile.
    bt = min(bt, _round_up(B, SUBLANE))
    # For larger batches force >= 2 grid steps so the "parallel" batch axis can
    # shard across both TensorCores on v7x (no-op on single-TC v5e/v6e).
    if B > 8 * SUBLANE:
        bt = min(bt, _round_up(_cdiv(B, 2), SUBLANE))
    return max(bt, SUBLANE)


def fcnn_forward(maps, action, params, b_tile=MAX_B_TILE,
                 use_bf16_activations=False):
    """maps: (B, C, H, W) float32, action: (B, A) float32 -> (B, output_dim)."""
    B = maps.shape[0]
    maps_flat = maps.reshape(B, -1)                 # == torch.flatten(start_dim=1)
    maps_features = maps_flat.shape[1]
    act_features = action.shape[1]

    (w1m, w1a, b1, w2, b2, w4, b4), out_dim = prepare_params(params, maps_features)

    if use_bf16_activations:
        # Opt-in: halves the dominant maps HBM read; accumulation stays f32.
        maps_flat = maps_flat.astype(jnp.bfloat16)
        action = action.astype(jnp.bfloat16)
        w1m = w1m.astype(jnp.bfloat16)
        w1a = w1a.astype(jnp.bfloat16)

    bt = _choose_b_tile(B, b_tile)
    grid = (_cdiv(B, bt),)   # ragged last tile: rows independent, store masked

    def resident(shape):
        # Weights/biases: same block every grid step -> stays VMEM-resident.
        return pl.BlockSpec(shape, lambda i: (0, 0))

    out = pl.pallas_call(
        fcnn_kernel,
        out_shape=jax.ShapeDtypeStruct((B, out_dim), jnp.float32),
        grid=grid,
        in_specs=[
            pl.BlockSpec((bt, maps_features), lambda i: (i, 0)),
            pl.BlockSpec((bt, act_features), lambda i: (i, 0)),
            resident(w1m.shape),
            resident(w1a.shape),
            resident(b1.shape),
            resident(w2.shape),
            resident(b2.shape),
            resident(w4.shape),
            resident(b4.shape),
        ],
        out_specs=pl.BlockSpec((bt, out_dim), lambda i: (i, 0)),
        compiler_params=pltpu.CompilerParams(
            dimension_semantics=("parallel",)),
    )(maps_flat, action, w1m, w1a, b1, w2, b2, w4, b4)

    return out


def init_params(key, input_dim=154, n_hidden_1=100, n_hidden_2=100,
                n_hidden_3=100, output_dim=1):
    """Deterministic init; weights stored as (in, out), biases as (1, out)."""
    dims = [(input_dim, n_hidden_1), (n_hidden_1, n_hidden_2),
            (n_hidden_2, n_hidden_3), (n_hidden_3, output_dim)]
    params = []
    for (fan_in, fan_out) in dims:
        key, kw, kb = jax.random.split(key, 3)
        bound = 1.0 / jnp.sqrt(fan_in)
        w = jax.random.uniform(kw, (fan_in, fan_out), jnp.float32, -bound, bound)
        b = jax.random.uniform(kb, (1, fan_out), jnp.float32, -bound, bound)
        params.append((w, b))
    return params


def fcnn_reference(maps, action, params):
    """Pure-JAX reference mirroring the PyTorch forward."""
    B = maps.shape[0]
    x = jnp.concatenate([maps.reshape(B, -1), action], axis=1)
    (w1, b1), (w2, b2), (w3, b3), (w4, b4) = params
    h1 = jnp.maximum(x @ w1 + b1, 0.0)
    h2 = jnp.maximum(h1 @ w2 + b2, 0.0)
    _h3 = jnp.maximum(h2 @ w3 + b3, 0.0)   # computed but unused, matches PyTorch
    return h2 @ w4 + b4


if __name__ == "__main__":
    key = jax.random.PRNGKey(0)
    k_maps, k_act, k_params = jax.random.split(key, 3)

    # Shapes consistent with input_dim=154: flatten(4,6,6)=144 + action 10 = 154.
    B, C, H, W, A = 2, 4, 6, 6, 10
    maps = jax.random.normal(k_maps, (B, C, H, W), jnp.float32)
    action = jax.random.normal(k_act, (B, A), jnp.float32)

    params = init_params(k_params, input_dim=C * H * W + A)

    out = fcnn_forward(maps, action, params)
    out = jax.block_until_ready(out)

    ref = fcnn_reference(maps, action, params)
    assert out.shape == (B, 1), out.shape
    assert jnp.allclose(out, ref, atol=1e-4, rtol=1e-4), (out, ref)

    # Also exercise a batch that is not a multiple of the tile (ragged last tile).
    B2 = 37
    maps2 = jax.random.normal(k_maps, (B2, C, H, W), jnp.float32)
    action2 = jax.random.normal(k_act, (B2, A), jnp.float32)
    out2 = jax.block_until_ready(fcnn_forward(maps2, action2, params, b_tile=16))
    ref2 = fcnn_reference(maps2, action2, params)
    assert out2.shape == (B2, 1), out2.shape
    assert jnp.allclose(out2, ref2, atol=1e-4, rtol=1e-4)

    print("KERNEL_OK")
</pallas_src>

<mosaic_0001>
module attributes {stable_mosaic.version = 11 : i64} {
  func.func @fcnn_kernel(%arg0: i32, %arg1: memref<8x144xf32, #tpu.memory_space<vmem>>, %arg2: memref<8x10xf32, #tpu.memory_space<vmem>>, %arg3: memref<144x128xf32, #tpu.memory_space<vmem>>, %arg4: memref<10x128xf32, #tpu.memory_space<vmem>>, %arg5: memref<1x128xf32, #tpu.memory_space<vmem>>, %arg6: memref<128x128xf32, #tpu.memory_space<vmem>>, %arg7: memref<1x128xf32, #tpu.memory_space<vmem>>, %arg8: memref<128x1xf32, #tpu.memory_space<vmem>>, %arg9: memref<1x1xf32, #tpu.memory_space<vmem>>, %arg10: memref<8x1xf32, #tpu.memory_space<vmem>>) attributes {dimension_semantics = [#tpu.dimension_semantics<parallel>], iteration_bounds = array<i64: 1>, scalar_prefetch = 0 : i64, scratch_operands = 0 : i64, tpu.core_type = #tpu.core_type<tc>, window_params = [{transform_indices = @transform_0, window_bounds = array<i64: 8, 144>}, {transform_indices = @transform_1, window_bounds = array<i64: 8, 10>}, {pipeline_mode = #tpu.pipeline_mode<synchronous>, transform_indices = @transform_2, window_bounds = array<i64: 144, 128>}, {pipeline_mode = #tpu.pipeline_mode<synchronous>, transform_indices = @transform_3, window_bounds = array<i64: 10, 128>}, {pipeline_mode = #tpu.pipeline_mode<synchronous>, transform_indices = @transform_4, window_bounds = array<i64: 1, 128>}, {pipeline_mode = #tpu.pipeline_mode<synchronous>, transform_indices = @transform_5, window_bounds = array<i64: 128, 128>}, {pipeline_mode = #tpu.pipeline_mode<synchronous>, transform_indices = @transform_6, window_bounds = array<i64: 1, 128>}, {pipeline_mode = #tpu.pipeline_mode<synchronous>, transform_indices = @transform_7, window_bounds = array<i64: 128, 1>}, {pipeline_mode = #tpu.pipeline_mode<synchronous>, transform_indices = @transform_8, window_bounds = array<i64: 1, 1>}, {transform_indices = @transform_9, window_bounds = array<i64: 8, 1>}]} {
    %c0 = arith.constant 0 : index
    %c0_0 = arith.constant 0 : index
    %0 = vector.load %arg1[%c0, %c0_0] : memref<8x144xf32, #tpu.memory_space<vmem>>, vector<8x144xf32>
    %c0_1 = arith.constant 0 : index
    %c0_2 = arith.constant 0 : index
    %1 = vector.load %arg3[%c0_1, %c0_2] : memref<144x128xf32, #tpu.memory_space<vmem>>, vector<144x128xf32>
    %cst = arith.constant dense<0.000000e+00> : vector<8x128xf32>
    %2 = tpu.matmul %0, %1, %cst {dimension_numbers = #tpu.dot_dimension_numbers<[1], [0], [0], [1], [0, 0, 1, 1], [], []>} : vector<8x144xf32>, vector<144x128xf32>, vector<8x128xf32> -> vector<8x128xf32>
    %c0_3 = arith.constant 0 : index
    %c0_4 = arith.constant 0 : index
    %3 = vector.load %arg2[%c0_3, %c0_4] : memref<8x10xf32, #tpu.memory_space<vmem>>, vector<8x10xf32>
    %c0_5 = arith.constant 0 : index
    %c0_6 = arith.constant 0 : index
    %4 = vector.load %arg4[%c0_5, %c0_6] : memref<10x128xf32, #tpu.memory_space<vmem>>, vector<10x128xf32>
    %cst_7 = arith.constant dense<0.000000e+00> : vector<8x128xf32>
    %5 = tpu.matmul %3, %4, %cst_7 {dimension_numbers = #tpu.dot_dimension_numbers<[1], [0], [0], [1], [0, 0, 1, 1], [], []>} : vector<8x10xf32>, vector<10x128xf32>, vector<8x128xf32> -> vector<8x128xf32>
    %6 = arith.addf %2, %5 : vector<8x128xf32>
    %c0_8 = arith.constant 0 : index
    %c0_9 = arith.constant 0 : index
    %7 = vector.load %arg5[%c0_8, %c0_9] : memref<1x128xf32, #tpu.memory_space<vmem>>, vector<1x128xf32>
    %8 = vector.broadcast %7 : vector<1x128xf32> to vector<8x128xf32>
    %9 = arith.addf %6, %8 : vector<8x128xf32>
    %cst_10 = arith.constant 0.000000e+00 : f32
    %10 = vector.broadcast %cst_10 : f32 to vector<8x128xf32>
    %11 = arith.maximumf %9, %10 : vector<8x128xf32>
    %c0_11 = arith.constant 0 : index
    %c0_12 = arith.constant 0 : index
    %12 = vector.load %arg6[%c0_11, %c0_12] : memref<128x128xf32, #tpu.memory_space<vmem>>, vector<128x128xf32>
    %cst_13 = arith.constant dense<0.000000e+00> : vector<8x128xf32>
    %13 = tpu.matmul %11, %12, %cst_13 {dimension_numbers = #tpu.dot_dimension_numbers<[1], [0], [0], [1], [0, 0, 1, 1], [], []>} : vector<8x128xf32>, vector<128x128xf32>, vector<8x128xf32> -> vector<8x128xf32>
    %c0_14 = arith.constant 0 : index
    %c0_15 = arith.constant 0 : index
    %14 = vector.load %arg7[%c0_14, %c0_15] : memref<1x128xf32, #tpu.memory_space<vmem>>, vector<1x128xf32>
    %15 = vector.broadcast %14 : vector<1x128xf32> to vector<8x128xf32>
    %16 = arith.addf %13, %15 : vector<8x128xf32>
    %cst_16 = arith.constant 0.000000e+00 : f32
    %17 = vector.broadcast %cst_16 : f32 to vector<8x128xf32>
    %18 = arith.maximumf %16, %17 : vector<8x128xf32>
    %c0_17 = arith.constant 0 : index
    %c0_18 = arith.constant 0 : index
    %19 = vector.load %arg8[%c0_17, %c0_18] : memref<128x1xf32, #tpu.memory_space<vmem>>, vector<128x1xf32>
    %cst_19 = arith.constant dense<0.000000e+00> : vector<8x1xf32>
    %20 = tpu.matmul %18, %19, %cst_19 {dimension_numbers = #tpu.dot_dimension_numbers<[1], [0], [0], [1], [0, 0, 1, 1], [], []>} : vector<8x128xf32>, vector<128x1xf32>, vector<8x1xf32> -> vector<8x1xf32>
    %c0_20 = arith.constant 0 : index
    %c0_21 = arith.constant 0 : index
    %21 = vector.load %arg9[%c0_20, %c0_21] : memref<1x1xf32, #tpu.memory_space<vmem>>, vector<1x1xf32>
    %22 = vector.broadcast %21 : vector<1x1xf32> to vector<8x1xf32>
    %23 = arith.addf %20, %22 : vector<8x1xf32>
    %c0_22 = arith.constant 0 : index
    %c0_23 = arith.constant 0 : index
    %24 = vector.load %arg10[%c0_22, %c0_23] : memref<8x1xf32, #tpu.memory_space<vmem>>, vector<8x1xf32>
    tpu.vector_store %arg10[%c0_22, %c0_23], %23 {strides = array<i32>} : memref<8x1xf32, #tpu.memory_space<vmem>>, vector<8x1xf32>,
    return
  }
  func.func @transform_0(%arg0: i32) -> (i32, i32) {
    %c0_i32 = arith.constant 0 : i32
    %c0_i32_0 = arith.constant 0 : i32
    return %arg0, %c0_i32 : i32, i32
  }
  func.func @transform_1(%arg0: i32) -> (i32, i32) {
    %c0_i32 = arith.constant 0 : i32
    %c0_i32_0 = arith.constant 0 : i32
    return %arg0, %c0_i32 : i32, i32
  }
  func.func @transform_2(%arg0: i32) -> (i32, i32) {
    %c0_i32 = arith.constant 0 : i32
    %c0_i32_0 = arith.constant 0 : i32
    %c0_i32_1 = arith.constant 0 : i32
    return %c0_i32, %c0_i32_0 : i32, i32
  }
  func.func @transform_3(%arg0: i32) -> (i32, i32) {
    %c0_i32 = arith.constant 0 : i32
    %c0_i32_0 = arith.constant 0 : i32
    %c0_i32_1 = arith.constant 0 : i32
    return %c0_i32, %c0_i32_0 : i32, i32
  }
  func.func @transform_4(%arg0: i32) -> (i32, i32) {
    %c0_i32 = arith.constant 0 : i32
    %c0_i32_0 = arith.constant 0 : i32
    %c0_i32_1 = arith.constant 0 : i32
    return %c0_i32, %c0_i32_0 : i32, i32
  }
  func.func @transform_5(%arg0: i32) -> (i32, i32) {
    %c0_i32 = arith.constant 0 : i32
    %c0_i32_0 = arith.constant 0 : i32
    %c0_i32_1 = arith.constant 0 : i32
    return %c0_i32, %c0_i32_0 : i32, i32
  }
  func.func @transform_6(%arg0: i32) -> (i32, i32) {
    %c0_i32 = arith.constant 0 : i32
    %c0_i32_0 = arith.constant 0 : i32
    %c0_i32_1 = arith.constant 0 : i32
    return %c0_i32, %c0_i32_0 : i32, i32
  }
  func.func @transform_7(%arg0: i32) -> (i32, i32) {
    %c0_i32 = arith.constant 0 : i32
    %c0_i32_0 = arith.constant 0 : i32
    %c0_i32_1 = arith.constant 0 : i32
    return %c0_i32, %c0_i32_0 : i32, i32
  }
  func.func @transform_8(%arg0: i32) -> (i32, i32) {
    %c0_i32 = arith.constant 0 : i32
    %c0_i32_0 = arith.constant 0 : i32
    %c0_i32_1 = arith.constant 0 : i32
    return %c0_i32, %c0_i32_0 : i32, i32
  }
  func.func @transform_9(%arg0: i32) -> (i32, i32) {
    %c0_i32 = arith.constant 0 : i32
    %c0_i32_0 = arith.constant 0 : i32
    return %arg0, %c0_i32 : i32, i32
  }
}

</mosaic_0001>

<bundles_post_ra>
// kernel: tpu_custom_call.1
= control target key start
LH: loop header
LB: loop body
LE: loop exit
PB: predicated region body
PF: predicated region fallthrough
CT: control target
= control target key end

     0   :  { %s944_s0 = inlined_call_operand.vmem [shape: f32[2,144], index: 0, kind: input, shape index: {}]   ;;  %s945_s1 = inlined_call_operand.vmem [shape: f32[2,10], index: 1, kind: input, shape index: {}]   ;;  %s946_s2 = inlined_call_operand.hbm [shape: f32[144,128], index: 2, kind: input, shape index: {}]   ;;  %s947_s3 = inlined_call_operand.vmem [shape: f32[10,128], index: 3, kind: input, shape index: {}]   ;;  %s948_s4 = inlined_call_operand.vmem [shape: f32[1,128], index: 4, kind: input, shape index: {}]   ;;  %s949_s5 = inlined_call_operand.vmem [shape: f32[128,128], index: 5, kind: input, shape index: {}]   ;;  %s950_s6 = inlined_call_operand.vmem [shape: f32[1,128], index: 6, kind: input, shape index: {}]   ;;  %s951_s7 = inlined_call_operand.vmem [shape: f32[128,1], index: 7, kind: input, shape index: {}]   ;;  %s952_s8 = inlined_call_operand.<no memory space> [shape: f32[1,1], index: 8, kind: input, shape index: {}]   ;;  %s953_s9 = inlined_call_operand.vmem [shape: f32[2,1], index: 9, kind: output, shape index: {}]  }
   0x1   :  { %v14_v0 = vstv %s952_s8 }
   0x2   :  { %15 = vst [vmem:[#allocation2] sm:$0x1] %v14_v0 }
   0x3   :  { %16 = vsyncpa [#allocation4], 0  ;;  %s720_s11 = smov [#allocation3]   ;;  %s696_s15 = scalar_lea.hbm %s946_s2, 2304 }
   0x4   :  { %s26_s12 = sshll.u32 %s720_s11, 4  ;;  %p697_p0 = scmp.ne.s32.totalorder %s946_s2, %s696_s15  ;;  %s27_s12 = int_to_ptr.vmem [resolvable:$true] %s26_s12 }
   0x5   :  { %p700_p1 = scmp.lt.u32.totalorder %s696_s15, %s946_s2 }
   0x7   :  { %p702_p2 = pnand %p700_p1, %p697_p0 }
   0x9   :  { %705 = shalt.err (!%p702_p2)
}
   0xa   :  { %s706_s8 = scalar_lea.vmem %s27_s12, 2304  ;;  %p711_p4 = scmp.lt.s32.totalorder %s27_s12, %s27_s12 }
   0xb   :  { %p707_p3 = scmp.ne.s32.totalorder %s27_s12, %s706_s8  ;;  %p712_p5 = scmp.lt.s32.totalorder %s706_s8, %s706_s8 }
   0xd   :  { %p713_p6 = por %p712_p5, %p711_p4 }
   0xf   :  { %p714_p7 = pnand %p713_p6, %p707_p3 }
  0x11   :  { %717 = shalt.err (!%p714_p7)
}
  0x12   :  { %s721_s20 = smov 128   ;;  %s722_s21 = smov 8  }
  0x13   :  { %32 = dma.hbm_to_vmem [thread:$0]  %s946_s2, 2304, %s27_s12, [#allocation4], %s721_s20, %s721_s20, %s722_s21  }
  0x14   :  { %718 = dma.done.wait [#allocation4], 2304  }
  0x15   :  { %719 = vsyncadd [#allocation4], 4294964992  ;;  %v723_v1 = vmov 0.0|0.0   ;;  %vm724_vm0 = vmmov 0   ;;  %v725_v2 = vmov 0.0   ;;  %vm77_vm1 = vcmask 1041408  }
  0x16   :  { %605 = vmatprep.subr.bf16.mxu1 %v723_v1  ;;  %636 = vmatprep.subr.bf16.mxu0 %v723_v1  ;;  %v71_v3 = vld [vmem:[%s947_s3] sm:$0xff]  ;;  %v72_v4 = vld [vmem:[%s947_s3 + $0x8] sm:$0x3]  ;;  %vm726_vm2 = vmmov 1   ;;  %vm73_vm4 = vcmask 80896   ;;  %v54_v10 = vld [vmem:[#allocation3 + $0x10] sm:$0xff] }
  0x17   :  { %532 = vmatprep.mubr.msk.f32.mxu1 %vm724_vm0, %v725_v2  ;;  %567 = vmatprep.mubr.msk.f32.mxu0 %vm724_vm0, %v725_v2  ;;  %vm607_vm3 = vmpackc.low %vm77_vm1, %vm726_vm2  ;;  %v606_v5 = vpack.c.bf16 %v72_v4, %v71_v3  ;;  %v52_v6 = vld [vmem:[#allocation3] sm:$0xff]  ;;  %v53_v7 = vld [vmem:[#allocation3 + $0x8] sm:$0xff]  ;;  %vm174_vm5 = vcmask 130048   ;;  %vm443_vm6 = vcmask 7168  }
  0x18   :  { %v70_v8 = vld [vmem:[%s945_s1] sm:$0xff]  ;;  %v610_v9 = vpack.c.bf16 %v53_v7, %v52_v6  ;;  %v57_v13 = vld [vmem:[#allocation3 + $0x28] sm:$0xff]  ;;  %v58_v18 = vld [vmem:[#allocation3 + $0x30] sm:$0xff] }
  0x19   :  { %608 = vmatpush3.bf16.msk.msra.mxu1 %vm607_vm3, %v606_v5  ;;  %v55_v11 = vld [vmem:[#allocation3 + $0x18] sm:$0xff]  ;;  %v56_v12 = vld [vmem:[#allocation3 + $0x20] sm:$0xff]  ;;  %v61_v23 = vld [vmem:[#allocation3 + $0x48] sm:$0xff] }
  0x1a   :  { %609 = vmatprep.subr.bf16.mxu1 %v723_v1  ;;  %v613_v14 = vpack.c.bf16 %v55_v11, %v54_v10  ;;  %v694_v15 = vld.sshfl [vmem:[%s944_s0] sm:$0xff pattern:$0x76325410]  ;;  %v695_v16 = vld.sshfl [vmem:[%s944_s0 + $0x8] sm:$0xff pattern:$0x76325410]  ;;  %v616_v17 = vpack.c.bf16 %v57_v13, %v56_v12 }
  0x1b   :  { %v59_v19 = vld [vmem:[#allocation3 + $0x38] sm:$0xff]  ;;  %v172_v20 = vcombine.high %v694_v15, %v695_v16  ;;  %v60_v22 = vld [vmem:[#allocation3 + $0x40] sm:$0xff]  ;;  %v62_v25 = vld [vmem:[#allocation3 + $0x50] sm:$0xff]  ;;  %v171_v37 = vcombine.low %v694_v15, %v695_v16 }
  0x1c   :  { %533 = vmatmul.mubr.msk.f32.vlgmr.msra.gmra.mrb[0].mxu1 %vm73_vm4, %v70_v8  ;;  %v619_v21 = vpack.c.bf16 %v59_v19, %v58_v18  ;;  %v622_v24 = vpack.c.bf16 %v61_v23, %v60_v22  ;;  %v63_v26 = vld [vmem:[#allocation3 + $0x58] sm:$0xff]  ;;  %v64_v28 = vld [vmem:[#allocation3 + $0x60] sm:$0xff]  ;;  %v65_v29 = vld [vmem:[#allocation3 + $0x68] sm:$0xff] }
  0x1d   :  { %611 = vmatpush1.bf16.msra.mxu1 %v610_v9  ;;  %487 = vmatprep.mubr.msk.f32.mxu1 %vm174_vm5, %v172_v20  ;;  %v625_v27 = vpack.c.bf16 %v63_v26, %v62_v25  ;;  %v628_v30 = vpack.c.bf16 %v65_v29, %v64_v28  ;;  %v66_v31 = vld [vmem:[#allocation3 + $0x70] sm:$0xff]  ;;  %v67_v32 = vld [vmem:[#allocation3 + $0x78] sm:$0xff]  ;;  %v68_v34 = vld [vmem:[#allocation3 + $0x80] sm:$0xff] }
  0x1e   :  { %612 = vmatprep.subr.bf16.mxu1 %v723_v1  ;;  %v631_v33 = vpack.c.bf16 %v67_v32, %v66_v31  ;;  %v69_v35 = vld [vmem:[#allocation3 + $0x88] sm:$0xff]  ;;  %v256_v38 = vld [vmem:[%s949_s5] sm:$0xff]  ;;  %v259_v42 = vld [vmem:[%s949_s5 + $0x18] sm:$0xff] }
  0x1f   :  { %v634_v36 = vpack.c.bf16 %v69_v35, %v68_v34  ;;  %v257_v39 = vld [vmem:[%s949_s5 + $0x8] sm:$0xff]  ;;  %v258_v40 = vld [vmem:[%s949_s5 + $0x10] sm:$0xff]  ;;  %v260_v44 = vld [vmem:[%s949_s5 + $0x20] sm:$0xff] }
  0x20   :  { %v637_v41 = vpack.c.bf16 %v257_v39, %v256_v38  ;;  %v640_v43 = vpack.c.bf16 %v259_v42, %v258_v40  ;;  %v261_v45 = vld [vmem:[%s949_s5 + $0x28] sm:$0xff]  ;;  %v262_v47 = vld [vmem:[%s949_s5 + $0x30] sm:$0xff]  ;;  %v263_v48 = vld [vmem:[%s949_s5 + $0x38] sm:$0xff] }
  0x21   :  { %614 = vmatpush1.bf16.msra.mxu1 %v613_v14  ;;  %v643_v46 = vpack.c.bf16 %v261_v45, %v260_v44  ;;  %v646_v49 = vpack.c.bf16 %v263_v48, %v262_v47  ;;  %v264_v50 = vld [vmem:[%s949_s5 + $0x40] sm:$0xff]  ;;  %v265_v51 = vld [vmem:[%s949_s5 + $0x48] sm:$0xff]  ;;  %v266_v53 = vld [vmem:[%s949_s5 + $0x50] sm:$0xff] }
  0x22   :  { %615 = vmatprep.subr.bf16.mxu1 %v723_v1  ;;  %638 = vmatpush3.bf16.msra.mxu0 %v637_v41  ;;  %v649_v52 = vpack.c.bf16 %v265_v51, %v264_v50  ;;  %v267_v54 = vld [vmem:[%s949_s5 + $0x58] sm:$0xff]  ;;  %v268_v56 = vld [vmem:[%s949_s5 + $0x60] sm:$0xff]  ;;  %v269_v57 = vld [vmem:[%s949_s5 + $0x68] sm:$0xff] }
  0x23   :  { %639 = vmatprep.subr.bf16.mxu0 %v723_v1  ;;  %v652_v55 = vpack.c.bf16 %v267_v54, %v266_v53  ;;  %v655_v58 = vpack.c.bf16 %v269_v57, %v268_v56  ;;  %v270_v59 = vld [vmem:[%s949_s5 + $0x70] sm:$0xff]  ;;  %v271_v60 = vld [vmem:[%s949_s5 + $0x78] sm:$0xff]  ;;  %v488_v3 = vld [vmem:[%s948_s4] ss:$0 sm:$0xff] }
  0x24   :  { %v658_v61 = vpack.c.bf16 %v271_v60, %v270_v59  ;;  %v350_v6 = vld [vmem:[%s951_s7] sm:$0xff]  ;;  %v351_v7 = vld [vmem:[%s951_s7 + $0x8] sm:$0xff]  ;;  %v352_v11 = vld [vmem:[%s951_s7 + $0x10] sm:$0xff] }
  0x25   :  { %617 = vmatpush1.bf16.msra.mxu1 %v616_v17  ;;  %v661_v9 = vpack.c.bf16 %v351_v7, %v350_v6  ;;  %v353_v12 = vld [vmem:[%s951_s7 + $0x18] sm:$0xff]  ;;  %v354_v14 = vld [vmem:[%s951_s7 + $0x20] sm:$0xff]  ;;  %v355_v15 = vld [vmem:[%s951_s7 + $0x28] sm:$0xff] }
  0x26   :  { %618 = vmatprep.subr.bf16.mxu1 %v723_v1  ;;  %641 = vmatpush3.bf16.msra.mxu0 %v640_v43  ;;  %v664_v13 = vpack.c.bf16 %v353_v12, %v352_v11  ;;  %v667_v16 = vpack.c.bf16 %v355_v15, %v354_v14  ;;  %v356_v17 = vld [vmem:[%s951_s7 + $0x30] sm:$0xff]  ;;  %v358_v19 = vld [vmem:[%s951_s7 + $0x40] sm:$0xff]  ;;  %v359_v20 = vld [vmem:[%s951_s7 + $0x48] sm:$0xff] }
  0x27   :  { %642 = vmatprep.subr.bf16.mxu0 %v723_v1  ;;  %v360_v22 = vld [vmem:[%s951_s7 + $0x50] sm:$0xff]  ;;  %v361_v23 = vld [vmem:[%s951_s7 + $0x58] sm:$0xff]  ;;  %v362_v25 = vld [vmem:[%s951_s7 + $0x60] sm:$0xff] }
  0x28   :  { %v363_v26 = vld [vmem:[%s951_s7 + $0x68] sm:$0xff]  ;;  %v364_v28 = vld [vmem:[%s951_s7 + $0x70] sm:$0xff]  ;;  %v365_v29 = vld [vmem:[%s951_s7 + $0x78] sm:$0xff] }
  0x29   :  { %620 = vmatpush1.bf16.msra.mxu1 %v619_v21  ;;  %v673_v21 = vpack.c.bf16 %v359_v20, %v358_v19  ;;  %v489_v31 = vld [vmem:[%s950_s6] ss:$0 sm:$0xff] }
  0x2a   :  { %621 = vmatprep.subr.bf16.mxu1 %v723_v1  ;;  %644 = vmatpush3.bf16.msra.mxu0 %v643_v46 }
  0x2b   :  { %645 = vmatprep.subr.bf16.mxu0 %v723_v1 }
  0x2d   :  { %623 = vmatpush1.bf16.msra.mxu1 %v622_v24  ;;  %v676_v24 = vpack.c.bf16 %v361_v23, %v360_v22 }
  0x2e   :  { %624 = vmatprep.subr.bf16.mxu1 %v723_v1  ;;  %647 = vmatpush3.bf16.msra.mxu0 %v646_v49 }
  0x2f   :  { %648 = vmatprep.subr.bf16.mxu0 %v723_v1 }
  0x31   :  { %626 = vmatpush1.bf16.msra.mxu1 %v625_v27  ;;  %v679_v27 = vpack.c.bf16 %v363_v26, %v362_v25 }
  0x32   :  { %627 = vmatprep.subr.bf16.mxu1 %v723_v1  ;;  %650 = vmatpush3.bf16.msra.mxu0 %v649_v52 }
  0x33   :  { %651 = vmatprep.subr.bf16.mxu0 %v723_v1 }
  0x35   :  { %629 = vmatpush1.bf16.msra.mxu1 %v628_v30  ;;  %v682_v30 = vpack.c.bf16 %v365_v29, %v364_v28 }
  0x36   :  { %630 = vmatprep.subr.bf16.mxu1 %v723_v1  ;;  %653 = vmatpush3.bf16.msra.mxu0 %v652_v55 }
  0x37   :  { %654 = vmatprep.subr.bf16.mxu0 %v723_v1 }
  0x39   :  { %632 = vmatpush1.bf16.msra.mxu1 %v631_v33 }
  0x3a   :  { %633 = vmatprep.subr.bf16.mxu1 %v723_v1  ;;  %656 = vmatpush3.bf16.msra.mxu0 %v655_v58 }
  0x3b   :  { %657 = vmatprep.subr.bf16.mxu0 %v723_v1 }
  0x3d   :  { %635 = vmatpush1.bf16.msra.mxu1 %v634_v36 }
  0x3e   :  { %659 = vmatpush3.bf16.msra.mxu0 %v658_v61 }
  0x3f   :  { %660 = vmatprep.subr.bf16.mxu0 %v723_v1 }
  0x40   :  { %242 = vmatmul.mubr.f32.vlgmr.msra.gmra.mrb[2].mxu1 %v171_v37 }
  0xef   :  { %v147_v62 = vpop.f32.mrb[0].mxu1 }
  0xf0   :  { %v534_v63 = vpop.f32.mrb[1].mxu1 }
 0x113   :  { %v243_v0 = vpop.f32.mrb[2].mxu1 }
 0x114   :  { %v244_v4 = vadd.f32 %v243_v0, %v147_v62  ;;  %v245_v5 = vpop.f32.mrb[3].mxu1 }
 0x116   :  { %v254_v8 = vadd.f32 %v488_v3, %v244_v4 }
 0x118   :  { %v255_v10 = vmax.f32 %v254_v8, 0.0 }
 0x11a   :  { %568 = vmatmul.mubr.f32.vlgmr.msra.gmra.mrb[0].mxu0 %v255_v10 }
 0x11b   :  { %662 = vmatpush3.bf16.msra.mxu0 %v661_v9  ;;  %602 = vmatprep.mubr.msk.f32.mxu0 %vm724_vm0, %v725_v2  ;;  %v357_v2 = vld [vmem:[%s951_s7 + $0x38] sm:$0xff] }
 0x11c   :  { %663 = vmatprep.subr.bf16.mxu0 %v723_v1  ;;  %v670_v18 = vpack.c.bf16 %v357_v2, %v356_v17 }
 0x11f   :  { %665 = vmatpush3.bf16.msra.mxu0 %v664_v13 }
 0x120   :  { %666 = vmatprep.subr.bf16.mxu0 %v723_v1 }
 0x123   :  { %668 = vmatpush3.bf16.msra.mxu0 %v667_v16 }
 0x124   :  { %669 = vmatprep.subr.bf16.mxu0 %v723_v1 }
 0x127   :  { %671 = vmatpush3.bf16.msra.mxu0 %v670_v18 }
 0x128   :  { %672 = vmatprep.subr.bf16.mxu0 %v723_v1 }
 0x12b   :  { %674 = vmatpush3.bf16.msra.mxu0 %v673_v21 }
 0x12c   :  { %675 = vmatprep.subr.bf16.mxu0 %v723_v1 }
 0x12f   :  { %677 = vmatpush3.bf16.msra.mxu0 %v676_v24 }
 0x130   :  { %678 = vmatprep.subr.bf16.mxu0 %v723_v1 }
 0x133   :  { %680 = vmatpush3.bf16.msra.mxu0 %v679_v27 }
 0x134   :  { %681 = vmatprep.subr.bf16.mxu0 %v723_v1  ;;  %v490_v1 = vld [vmem:[#allocation2] ss:$0 sm:$0xff] }
 0x137   :  { %683 = vmatpush3.bf16.msra.mxu0 %v682_v30 }
 0x1ed   :  { %v345_v32 = vpop.f32.mrb[0].mxu0 }
 0x1ee   :  { %v346_v33 = vadd.f32 %v489_v31, %v345_v32  ;;  %v569_v34 = vpop.f32.mrb[1].mxu0 }
 0x1f0   :  { %v349_v35 = vmax.f32 %v346_v33, 0.0 }
 0x1f2   :  { %603 = vmatmul.mubr.f32.vlgmr.msra.gmra.mrb[2].mxu0 %v349_v35 }
 0x2c5   :  { %v439_v36 = vpop.f32.mrb[2].mxu0 }
 0x2c6   :  { %v440_v37 = vadd.f32 %v490_v1, %v439_v36  ;;  %v604_v38 = vpop.f32.mrb[3].mxu0 }
 0x2c8   :  { %444 = vst.msk [vmem:[#allocation5] sm:$0xff] %vm443_vm6, %v440_v37 }
 0x2cf   :  { %v462_v39 = vld [vmem:[#allocation5] sm:$0x3] }
 0x2d0   :  { %463 = vst [vmem:[%s953_s9] sm:$0x3] %v462_v39 }
 0x2d1   :  { %480 = vsyncpa [#allocation4], 1 }

</bundles_post_ra>
